<compile_context>
chip_gen: v7x
topology: tpu7x:2x2x1
jax: 0.10.0
libtpu: 0.0.40
codegen_flags: <defaults>
</compile_context>

<pallas_src>
import functools

import jax
import jax.numpy as jnp
from jax import lax
from jax.experimental import pallas as pl
from jax.experimental.pallas import tpu as pltpu


def _round_up(x, m):
    return (x + m - 1) // m * m


def _partial_loss_kernel(x_ref, t_ref, lsum_ref, cnt_ref, *,
                         n_pixels, tn, tiles_per_part):
    # x_ref: (1, C, TN) logits tile (native dtype) for sample b
    # t_ref: (1, 1, TN) integer labels tile (narrow dtype; label >= C => unannotated)
    # lsum_ref / cnt_ref: (1, 1, 128) f32 per-(sample,part) accumulators
    n = pl.program_id(2)

    @pl.when(n == 0)
    def _init():
        lsum_ref[...] = jnp.zeros_like(lsum_ref)
        cnt_ref[...] = jnp.zeros_like(cnt_ref)

    x = x_ref[0].astype(jnp.float32)            # (C, TN)  f32 compute path
    t = t_ref[0].astype(jnp.int32)              # (1, TN)  widen after the VMEM load
    C = x.shape[0]

    # Logical tile index.  It can exceed the last real tile (odd tile count
    # split over 2 parts); the DMA index is clamped in the index_map and the
    # pixel-bound mask below zeroes the contribution of such phantom steps and
    # of out-of-range lanes of the (unpadded) final block.
    tile = pl.program_id(1) * tiles_per_part + n
    lane = lax.broadcasted_iota(jnp.int32, t.shape, 1)            # (1, TN)
    # NOTE: matches the reference exactly (`t < C`); if negative "ignore"
    # labels were possible this would need an extra `(t >= 0) &`.
    mask = (t < C) & ((tile * tn + lane) < n_pixels)              # (1, TN)

    # log-softmax over the class (sublane) axis; reuse x - m for both terms:
    #   nll = log(sum_c exp(x_c - m)) - (x_t - m)
    m = jnp.max(x, axis=0, keepdims=True)                                   # (1, TN)
    xm = x - m                                                              # (C, TN)
    cls = lax.broadcasted_iota(jnp.int32, x.shape, 0)                       # (C, TN)
    tgt = jnp.sum(jnp.where(cls == t, xm, 0.0), axis=0, keepdims=True)      # (1, TN)
    sum_exp = jnp.sum(jnp.exp(xm), axis=0, keepdims=True)                   # (1, TN)
    nll = jnp.log(sum_exp) - tgt                                            # (1, TN)

    # f32 accumulation: pixel counts exact up to 2^24 per sample (fine for images)
    lsum = jnp.sum(jnp.where(mask, nll, 0.0), axis=1, keepdims=True)        # (1, 1)
    cnt = jnp.sum(mask.astype(jnp.float32), axis=1, keepdims=True)          # (1, 1)

    lsum_ref[...] = lsum_ref[...] + lsum.reshape(1, 1, 1)
    cnt_ref[...] = cnt_ref[...] + cnt.reshape(1, 1, 1)


def _plan(n_pixels, nb_classes, logit_dtype):
    """Pick the spatial tile TN (multiple of 128, or == N) and a scoped-VMEM
    limit, budgeting the *padded* per-step footprint per chip generation."""
    itemsize = jnp.dtype(logit_dtype).itemsize
    c_pad_native = _round_up(nb_classes, max(8, 32 // itemsize))  # sublane padding
    c_pad_32 = _round_up(nb_classes, 8)                           # f32/i32 temporaries
    # VMEM bytes needed per pixel column (lane) of one grid step:
    bytes_per_px = (
        2 * c_pad_native * itemsize   # logits tile, double-buffered, sublane-padded
        + 2 * 32                      # label tile: (1,1,TN) pads to ~8 sublanes x 4B
        + 6 * c_pad_32 * 4            # Mosaic temporaries (cast/sub/iota/where/exp)
    )

    mib = 1024 * 1024
    try:
        vmem_cap = int(pltpu.get_tpu_info().vmem_capacity_bytes)
    except Exception:
        vmem_cap = 64 * mib           # conservative (v7x per-core VMEM)

    # ~48 MiB/step on 128-MiB chips (v5e/v6e), ~24 MiB/step on 64-MiB v7x.
    footprint_budget = min(max(vmem_cap // 2 - 8 * mib, 16 * mib), 48 * mib)
    # Explicit scoped-VMEM limit: well above the footprint, below physical.
    vmem_limit = int(min(vmem_cap - 8 * mib, footprint_budget + 48 * mib))

    tn_cap = max(128, (footprint_budget // bytes_per_px) // 128 * 128)
    if n_pixels <= 128:
        tn = n_pixels                       # single full-extent block
    elif n_pixels % 128 == 0:
        tn = min(tn_cap, n_pixels)
    else:
        tn = min(tn_cap, (n_pixels // 128) * 128)   # final block is partial (masked)
    return tn, vmem_limit


def partial_loss(outputs, partial_target, nb_classes, spatial_tile=None):
    """outputs: (B, C, H, W) float logits (any float dtype, bf16 preferred);
    partial_target: (B, H, W) integer labels (narrow dtype preferred),
    label >= nb_classes means unannotated."""
    B, C, H, W = outputs.shape
    assert C == nb_classes
    N = H * W

    x = outputs.reshape(B, C, N)             # native dtype, metadata-only reshape
    t = partial_target.reshape(B, 1, N)      # native narrow int dtype, no copy
    if not jnp.issubdtype(t.dtype, jnp.integer):
        t = t.astype(jnp.int32)

    TN, vmem_limit = _plan(N, C, x.dtype)
    if spatial_tile is not None:
        assert spatial_tile == N or spatial_tile % 128 == 0
        TN = spatial_tile

    n_tiles = pl.cdiv(N, TN)
    # 2-way spatial split keeps both v7x TensorCores busy even when B is 1/odd;
    # it is a near-no-op on single-TC v5e/v6e.
    parts = 2 if n_tiles >= 2 else 1
    tpp = pl.cdiv(n_tiles, parts)            # tiles per part
    last_tile = n_tiles - 1

    def in_idx(b, p, n):
        # clamp phantom steps (odd n_tiles split over 2 parts) to a valid tile;
        # the in-kernel mask zeroes their contribution.
        return (b, 0, jnp.minimum(p * tpp + n, last_tile))

    def out_idx(b, p, n):
        return (b * parts + p, 0, 0)

    kernel = functools.partial(_partial_loss_kernel,
                               n_pixels=N, tn=TN, tiles_per_part=tpp)

    lsum, cnt = pl.pallas_call(
        kernel,
        out_shape=(jax.ShapeDtypeStruct((B * parts, 1, 128), jnp.float32),
                   jax.ShapeDtypeStruct((B * parts, 1, 128), jnp.float32)),
        grid_spec=pltpu.PrefetchScalarGridSpec(
            num_scalar_prefetch=0,
            grid=(B, parts, tpp),
            in_specs=[
                pl.BlockSpec((1, C, TN), in_idx),
                pl.BlockSpec((1, 1, TN), in_idx),
            ],
            out_specs=[
                pl.BlockSpec((1, 1, 128), out_idx),
                pl.BlockSpec((1, 1, 128), out_idx),
            ],
        ),
        compiler_params=pltpu.CompilerParams(
            dimension_semantics=("parallel", "parallel", "arbitrary"),
            vmem_limit_bytes=vmem_limit),
    )(x, t)

    # tiny epilogue over B*parts scalars: combine parts, per-sample mean, then
    # mean over samples that have at least one annotated pixel (0.0 if none).
    lsum_b = lsum[:, 0, 0].reshape(B, parts).sum(axis=1)
    cnt_b = cnt[:, 0, 0].reshape(B, parts).sum(axis=1)
    has = cnt_b > 0.0
    per_sample = jnp.where(has, lsum_b / jnp.maximum(cnt_b, 1.0), 0.0)
    total = jnp.sum(has.astype(jnp.float32))
    return jnp.where(total > 0.0,
                     jnp.sum(per_sample) / jnp.maximum(total, 1.0),
                     jnp.float32(0.0))


def _reference_partial_loss(outputs, partial_target, nb_classes):
    """Pure-JAX (eager) mirror of the PyTorch forward with CE criterion."""
    B, C, H, W = outputs.shape
    loss_target = 0.0
    total = 0
    for i in range(B):
        t = partial_target[i].reshape(-1)
        x = outputs[i].reshape(C, -1)
        sel = t < nb_classes
        n_annot = int(jnp.sum(sel))
        if n_annot > 0:
            xs = x[:, sel].astype(jnp.float32)              # (C, n_annot)
            ts = t[sel]                                     # (n_annot,)
            logp = jax.nn.log_softmax(xs, axis=0)
            nll = -logp[ts, jnp.arange(n_annot)]
            loss_target = loss_target + jnp.mean(nll)
            total += 1
    return loss_target / total if total > 0 else jnp.float32(0.0)


if __name__ == "__main__":
    key = jax.random.PRNGKey(0)
    k1, k2, k3, k4 = jax.random.split(key, 4)

    # Test 1: f32 logits, 16x16 image, narrow (int8) labels streamed natively.
    B, C, H, W = 2, 4, 16, 16
    outputs_f32 = jax.random.normal(k1, (B, C, H, W), dtype=jnp.float32)
    # labels in [0, C]; value == C means "unannotated" (ignored by the loss)
    partial_target = jax.random.randint(k2, (B, H, W), 0, C + 1,
                                        dtype=jnp.int32).astype(jnp.int8)

    result = jax.block_until_ready(partial_loss(outputs_f32, partial_target, nb_classes=C))
    ref = _reference_partial_loss(outputs_f32, partial_target, nb_classes=C)
    assert jnp.allclose(result, ref, atol=1e-4, rtol=1e-4), (result, ref)

    # Test 2: native-bf16 logits take the half-bandwidth HBM path (no wrapper up-cast).
    outputs_bf16 = outputs_f32.astype(jnp.bfloat16)
    result_bf = jax.block_until_ready(partial_loss(outputs_bf16, partial_target, nb_classes=C))
    ref_bf = _reference_partial_loss(outputs_bf16, partial_target, nb_classes=C)
    assert jnp.allclose(result_bf, ref_bf, atol=1e-3, rtol=1e-3), (result_bf, ref_bf)

    # Test 3: non-multiple-of-128 spatial size (no wrapper pad) + forced small
    # tile: exercises the masked partial final block, the clamped phantom tile
    # and the 2-way spatial ("megacore") split with B == 1.
    B2, H2, W2 = 1, 23, 29
    outputs2 = jax.random.normal(k3, (B2, C, H2, W2), dtype=jnp.float32)
    target2 = jax.random.randint(k4, (B2, H2, W2), 0, C + 1,
                                 dtype=jnp.int32).astype(jnp.int8)
    result2 = jax.block_until_ready(
        partial_loss(outputs2, target2, nb_classes=C, spatial_tile=256))
    ref2 = _reference_partial_loss(outputs2, target2, nb_classes=C)
    assert jnp.allclose(result2, ref2, atol=1e-4, rtol=1e-4), (result2, ref2)

    print("KERNEL_OK")
</pallas_src>

<mosaic_0001>
module attributes {stable_mosaic.version = 11 : i64} {
  func.func @_partial_loss_kernel(%arg0: i32, %arg1: i32, %arg2: i32, %arg3: memref<1x4x256xf32, #tpu.memory_space<vmem>>, %arg4: memref<1x1x256xi8, #tpu.memory_space<vmem>>, %arg5: memref<1x1x128xf32, #tpu.memory_space<vmem>>, %arg6: memref<1x1x128xf32, #tpu.memory_space<vmem>>) attributes {dimension_semantics = [#tpu.dimension_semantics<parallel>, #tpu.dimension_semantics<parallel>, #tpu.dimension_semantics<arbitrary>], iteration_bounds = array<i64: 2, 1, 1>, scalar_prefetch = 0 : i64, scratch_operands = 0 : i64, tpu.core_type = #tpu.core_type<tc>, window_params = [{transform_indices = @transform_0, window_bounds = array<i64: 1, 4, 256>}, {transform_indices = @transform_1, window_bounds = array<i64: 1, 1, 256>}, {transform_indices = @transform_2, window_bounds = array<i64: 1, 1, 128>}, {transform_indices = @transform_3, window_bounds = array<i64: 1, 1, 128>}]} {
    %c0_i32 = arith.constant 0 : i32
    %0 = arith.cmpi eq, %arg2, %c0_i32 : i32
    %1 = arith.extui %0 : i1 to i32
    %c0_i32_0 = arith.constant 0 : i32
    %2 = arith.cmpi ne, %1, %c0_i32_0 : i32
    scf.if %2 {
      %cst_25 = arith.constant 0.000000e+00 : f32
      %53 = vector.broadcast %cst_25 : f32 to vector<1x1x128xf32>
      %c0_26 = arith.constant 0 : index
      %c0_27 = arith.constant 0 : index
      %c0_28 = arith.constant 0 : index
      %54 = vector.load %arg5[%c0_26, %c0_27, %c0_28] : memref<1x1x128xf32, #tpu.memory_space<vmem>>, vector<1x1x128xf32>
      tpu.vector_store %arg5[%c0_26, %c0_27, %c0_28], %53 {strides = array<i32>} : memref<1x1x128xf32, #tpu.memory_space<vmem>>, vector<1x1x128xf32>,
      %cst_29 = arith.constant 0.000000e+00 : f32
      %55 = vector.broadcast %cst_29 : f32 to vector<1x1x128xf32>
      %c0_30 = arith.constant 0 : index
      %c0_31 = arith.constant 0 : index
      %c0_32 = arith.constant 0 : index
      %56 = vector.load %arg6[%c0_30, %c0_31, %c0_32] : memref<1x1x128xf32, #tpu.memory_space<vmem>>, vector<1x1x128xf32>
      tpu.vector_store %arg6[%c0_30, %c0_31, %c0_32], %55 {strides = array<i32>} : memref<1x1x128xf32, #tpu.memory_space<vmem>>, vector<1x1x128xf32>,
    } else {
    }
    %c0 = arith.constant 0 : index
    %c0_1 = arith.constant 0 : index
    %c0_2 = arith.constant 0 : index
    %3 = vector.load %arg3[%c0, %c0_1, %c0_2] : memref<1x4x256xf32, #tpu.memory_space<vmem>>, vector<1x4x256xf32>
    %4 = vector.shape_cast %3 : vector<1x4x256xf32> to vector<4x256xf32>
    %c0_3 = arith.constant 0 : index
    %c0_4 = arith.constant 0 : index
    %c0_5 = arith.constant 0 : index
    %5 = vector.load %arg4[%c0_3, %c0_4, %c0_5] : memref<1x1x256xi8, #tpu.memory_space<vmem>>, vector<1x1x256xi8>
    %6 = vector.shape_cast %5 : vector<1x1x256xi8> to vector<1x256xi8>
    %7 = arith.extsi %6 : vector<1x256xi8> to vector<1x256xi32>
    %c1_i32 = arith.constant 1 : i32
    %8 = arith.muli %arg1, %c1_i32 : i32
    %9 = arith.addi %8, %arg2 : i32
    %10 = tpu.iota {dimensions = array<i32: 1>} : vector<1x256xi32>
    %c4_i32 = arith.constant 4 : i32
    %11 = vector.broadcast %c4_i32 : i32 to vector<1x256xi32>
    %12 = arith.cmpi slt, %7, %11 : vector<1x256xi32>
    %c256_i32 = arith.constant 256 : i32
    %13 = arith.muli %9, %c256_i32 : i32
    %14 = vector.broadcast %13 : i32 to vector<1x256xi32>
    %15 = arith.addi %14, %10 : vector<1x256xi32>
    %c256_i32_6 = arith.constant 256 : i32
    %16 = vector.broadcast %c256_i32_6 : i32 to vector<1x256xi32>
    %17 = arith.cmpi slt, %15, %16 : vector<1x256xi32>
    %18 = arith.andi %12, %17 : vector<1x256xi1>
    %cst = arith.constant dense<0xFF800000> : vector<256xf32>
    %19 = vector.multi_reduction <maximumf>, %4, %cst [0] : vector<4x256xf32> to vector<256xf32>
    %20 = vector.shape_cast %19 : vector<256xf32> to vector<1x256xf32>
    %21 = vector.broadcast %20 : vector<1x256xf32> to vector<4x256xf32>
    %22 = arith.subf %4, %21 : vector<4x256xf32>
    %23 = tpu.iota {dimensions = array<i32: 0>} : vector<4x256xi32>
    %24 = vector.broadcast %7 : vector<1x256xi32> to vector<4x256xi32>
    %25 = arith.cmpi eq, %23, %24 : vector<4x256xi32>
    %cst_7 = arith.constant 0.000000e+00 : f32
    %26 = vector.broadcast %cst_7 : f32 to vector<4x256xf32>
    %27 = arith.select %25, %22, %26 : vector<4x256xi1>, vector<4x256xf32>
    %cst_8 = arith.constant dense<0.000000e+00> : vector<256xf32>
    %28 = vector.multi_reduction <add>, %27, %cst_8 [0] : vector<4x256xf32> to vector<256xf32>
    %29 = vector.shape_cast %28 : vector<256xf32> to vector<1x256xf32>
    %30 = math.exp %22 : vector<4x256xf32>
    %cst_9 = arith.constant dense<0.000000e+00> : vector<256xf32>
    %31 = vector.multi_reduction <add>, %30, %cst_9 [0] : vector<4x256xf32> to vector<256xf32>
    %32 = vector.shape_cast %31 : vector<256xf32> to vector<1x256xf32>
    %33 = math.log %32 : vector<1x256xf32>
    %34 = arith.subf %33, %29 : vector<1x256xf32>
    %cst_10 = arith.constant 0.000000e+00 : f32
    %35 = vector.broadcast %cst_10 : f32 to vector<1x256xf32>
    %36 = arith.select %18, %34, %35 : vector<1x256xi1>, vector<1x256xf32>
    %cst_11 = arith.constant dense<0.000000e+00> : vector<1xf32>
    %37 = vector.multi_reduction <add>, %36, %cst_11 [1] : vector<1x256xf32> to vector<1xf32>
    %38 = vector.shape_cast %37 : vector<1xf32> to vector<1x1xf32>
    %39 = arith.extui %18 : vector<1x256xi1> to vector<1x256xi32>
    %40 = arith.sitofp %39 : vector<1x256xi32> to vector<1x256xf32>
    %cst_12 = arith.constant dense<0.000000e+00> : vector<1xf32>
    %41 = vector.multi_reduction <add>, %40, %cst_12 [1] : vector<1x256xf32> to vector<1xf32>
    %42 = vector.shape_cast %41 : vector<1xf32> to vector<1x1xf32>
    %c0_13 = arith.constant 0 : index
    %c0_14 = arith.constant 0 : index
    %c0_15 = arith.constant 0 : index
    %43 = vector.load %arg5[%c0_13, %c0_14, %c0_15] : memref<1x1x128xf32, #tpu.memory_space<vmem>>, vector<1x1x128xf32>
    %44 = vector.shape_cast %38 : vector<1x1xf32> to vector<1x1x1xf32>
    %45 = vector.broadcast %44 : vector<1x1x1xf32> to vector<1x1x128xf32>
    %46 = arith.addf %43, %45 : vector<1x1x128xf32>
    %c0_16 = arith.constant 0 : index
    %c0_17 = arith.constant 0 : index
    %c0_18 = arith.constant 0 : index
    %47 = vector.load %arg5[%c0_16, %c0_17, %c0_18] : memref<1x1x128xf32, #tpu.memory_space<vmem>>, vector<1x1x128xf32>
    tpu.vector_store %arg5[%c0_16, %c0_17, %c0_18], %46 {strides = array<i32>} : memref<1x1x128xf32, #tpu.memory_space<vmem>>, vector<1x1x128xf32>,
    %c0_19 = arith.constant 0 : index
    %c0_20 = arith.constant 0 : index
    %c0_21 = arith.constant 0 : index
    %48 = vector.load %arg6[%c0_19, %c0_20, %c0_21] : memref<1x1x128xf32, #tpu.memory_space<vmem>>, vector<1x1x128xf32>
    %49 = vector.shape_cast %42 : vector<1x1xf32> to vector<1x1x1xf32>
    %50 = vector.broadcast %49 : vector<1x1x1xf32> to vector<1x1x128xf32>
    %51 = arith.addf %48, %50 : vector<1x1x128xf32>
    %c0_22 = arith.constant 0 : index
    %c0_23 = arith.constant 0 : index
    %c0_24 = arith.constant 0 : index
    %52 = vector.load %arg6[%c0_22, %c0_23, %c0_24] : memref<1x1x128xf32, #tpu.memory_space<vmem>>, vector<1x1x128xf32>
    tpu.vector_store %arg6[%c0_22, %c0_23, %c0_24], %51 {strides = array<i32>} : memref<1x1x128xf32, #tpu.memory_space<vmem>>, vector<1x1x128xf32>,
    return
  }
  func.func @transform_0(%arg0: i32, %arg1: i32, %arg2: i32) -> (i32, i32, i32) {
    %c1_i32 = arith.constant 1 : i32
    %0 = arith.muli %arg1, %c1_i32 : i32
    %1 = arith.addi %0, %arg2 : i32
    %c0_i32 = arith.constant 0 : i32
    %2 = arith.minsi %1, %c0_i32 : i32
    %c0_i32_0 = arith.constant 0 : i32
    %c0_i32_1 = arith.constant 0 : i32
    return %arg0, %c0_i32_0, %2 : i32, i32, i32
  }
  func.func @transform_1(%arg0: i32, %arg1: i32, %arg2: i32) -> (i32, i32, i32) {
    %c1_i32 = arith.constant 1 : i32
    %0 = arith.muli %arg1, %c1_i32 : i32
    %1 = arith.addi %0, %arg2 : i32
    %c0_i32 = arith.constant 0 : i32
    %2 = arith.minsi %1, %c0_i32 : i32
    %c0_i32_0 = arith.constant 0 : i32
    %c0_i32_1 = arith.constant 0 : i32
    return %arg0, %c0_i32_0, %2 : i32, i32, i32
  }
  func.func @transform_2(%arg0: i32, %arg1: i32, %arg2: i32) -> (i32, i32, i32) {
    %c1_i32 = arith.constant 1 : i32
    %0 = arith.muli %arg0, %c1_i32 : i32
    %1 = arith.addi %0, %arg1 : i32
    %c0_i32 = arith.constant 0 : i32
    %c0_i32_0 = arith.constant 0 : i32
    %c0_i32_1 = arith.constant 0 : i32
    return %1, %c0_i32, %c0_i32_0 : i32, i32, i32
  }
  func.func @transform_3(%arg0: i32, %arg1: i32, %arg2: i32) -> (i32, i32, i32) {
    %c1_i32 = arith.constant 1 : i32
    %0 = arith.muli %arg0, %c1_i32 : i32
    %1 = arith.addi %0, %arg1 : i32
    %c0_i32 = arith.constant 0 : i32
    %c0_i32_0 = arith.constant 0 : i32
    %c0_i32_1 = arith.constant 0 : i32
    return %1, %c0_i32, %c0_i32_0 : i32, i32, i32
  }
}

</mosaic_0001>

<bundles_post_ra>
// kernel: tpu_custom_call.1
= control target key start
LH: loop header
LB: loop body
LE: loop exit
PB: predicated region body
PF: predicated region fallthrough
CT: control target
= control target key end

     0   :  { %9 = vsyncpa [#allocation3], 0  ;;  %s1117_s0 = inlined_call_operand.hbm [shape: f32[2,4,256], index: 0, kind: input, shape index: {}]   ;;  %s1118_s1 = inlined_call_operand.vmem [shape: s8[2,1,256], index: 1, kind: input, shape index: {}]   ;;  %s1119_s2 = inlined_call_operand.hbm [shape: f32[2,1,128], index: 2, kind: output, shape index: {0}]   ;;  %s1120_s3 = inlined_call_operand.hbm [shape: f32[2,1,128], index: 3, kind: output, shape index: {1}]  }
   0x1   :  { %11 = vsyncpa [#allocation3 + $0x1], 0 }
   0x2   :  { %12 = vsyncpa [#allocation4], 0 }
   0x3   :  { %14 = vsyncpa [#allocation4 + $0x1], 0 }
   0x4   :  { %15 = vsyncpa [#allocation7], 0 }
   0x5   :  { %17 = vsyncpa [#allocation7 + $0x1], 0  ;;  %s870_s12 = smov 0   ;;  %s872_s13 = smov 0  }
   0x6   :  { %s874_s14 = smov 0   ;;  %s876_s15 = smov 0  }
   0x7   :  { %s878_s16 = smov 0   ;;  %s880_s17 = smov 0  }
   0x8 LB: > { %s607_s18 = sadd.s32 4294967295, %s843_s17   ;;  %s608_s19 = sadd.s32 4294967294, %s843_s17   ;;  %s843_s17 = sphi %s880_s17, %s23_s17   ;;  %s839_s16 = sphi %s878_s16, %s1136_s16   ;;  %s835_s15 = sphi %s876_s15, %s1135_s15   ;;  %s831_s14 = sphi %s874_s14, %s1134_s14   ;;  %s827_s13 = sphi %s872_s13, %s1133_s13   ;;  %s823_s12 = sphi %s870_s12, %s1132_s12  }
   0x9   : > { %s42_s20 = sadd.s32 1, %s839_s16  ;;  %s57_s21 = sadd.s32 1, %s831_s14 }
   0xa   : > { %p44_p0 = scmp.ge.s32.totalorder %s42_s20, 2  ;;  %p64_p1 = scmp.ne.s32.totalorder %s831_s14, %s827_s13 }
   0xb   : > { %p65_p2 = scmp.eq.s32.totalorder %s843_s17, 0  ;;  %p70_p3 = scmp.ne.s32.totalorder %s827_s13, %s823_s12 }
   0xc   : > { %s1138_s20 = smov (%p44_p0, %s42_s20), 0  ;;  %p71_p5 = scmp.eq.s32.totalorder %s607_s18, 0 }
   0xd   : > { %p911_p4 = por %p65_p2, %p64_p1  ;;  %s52_s23 = ssub.s32 %s839_s16, %s1138_s20 }
   0xe   : > { %p130_p6 = scmp.eq.s32.totalorder %s607_s18, 1  ;;  %p55_p7 = scmp.eq.s32.totalorder %s52_s23, 0 }
   0xf   : > { %p917_p8 = por %p71_p5, %p70_p3  ;;  %p136_p10 = scmp.eq.s32.totalorder %s608_s19, 1 }
  0x10   : > { %p921_p9 = por %p130_p6, %p64_p1  ;;  %p640_p13 = scmp.lt.s32.totalorder %s843_s17, 2 }
  0x11   : > { %s926_s26 = scalar_select %p55_p7, %s831_s14, %s57_s21  }
  0x12   : > { %s1124_s25 = scalar_select %p921_p9, 1, 0 }
  0x13   : > { %p928_p11 = por %p136_p10, %p70_p3  ;;  %s184_s28 = sand.u32 1, %s831_s14  }
  0x14   : > { %s611_s29 = sshll.u32 %s184_s28, 3  ;;  %s622_s30 = sshll.u32 %s839_s16, 7 }
  0x15   : > { %s1125_s27 = scalar_select %p928_p11, 1, 0 }
  0x16   : > { %s939_s6 = scalar_lea.hbm %s1117_s0, %s622_s30  ;;  %s188_s7 = scalar_lea.vmem [#allocation2], %s611_s29 }
  0x17   : > { %s201_s8 = sshll.u32 %s188_s7, 4  ;;  %p945_p0 = pnand %p640_p13, %p911_p4  ;;  %s941_s8 = int_to_ptr.vmem [resolvable:$true] %s201_s8 }
  0x18   : > { %s185_s10 = scalar_lea.sflag [#allocation3], %s184_s28  ;;  %s699_s11 = scalar_lea.hbm %s939_s6, 128 }
  0x19   : > { %p700_p3 = scmp.ne.s32.totalorder %s939_s6, %s699_s11  ;;  %p701_p5 = pneg %p945_p0 }
  0x1a   : > { %s704_s21 = scalar_lea.hbm %s1117_s0, 256  ;;  %p705_p4 = scmp.lt.u32.totalorder %s939_s6, %s1117_s0 }
  0x1b   : > { %p702_p6 = pnand %p701_p5, %p700_p3  ;;  %p706_p10 = scmp.lt.u32.totalorder %s704_s21, %s699_s11 }
  0x1c   : > { %p708_p12 = scmp.lt.u32.totalorder %s699_s11, %s939_s6 }
  0x1d   : > { %p703_p7 = pneg %p702_p6  ;;  %p707_p13 = por %p706_p10, %p705_p4 }
  0x1f   : > { %p709_p1 = por %p708_p12, %p707_p13 }
  0x21   : > { %p710_p2 = pnand %p709_p1, %p703_p7 }
  0x23   : > { %713 = shalt.err (!%p710_p2)
}
  0x24   : > { %s714_s28 = scalar_lea.vmem %s941_s8, 128  ;;  %s845_s29 = smov [#allocation2]  }
  0x25   : > { %p715_p3 = scmp.ne.s32.totalorder %s941_s8, %s714_s28  ;;  %s719_s30 = sshll.u32 %s845_s29, 4  ;;  %s720_s30 = int_to_ptr.vmem [resolvable:$false] %s719_s30 }
  0x26   : > { %s721_s4 = scalar_lea.vmem %s720_s30, 256  ;;  %p722_p9 = scmp.lt.s32.totalorder %s941_s8, %s720_s30 }
  0x27   : > { %p717_p6 = pnand %p715_p3, %p701_p5  ;;  %p723_p4 = scmp.lt.s32.totalorder %s721_s4, %s714_s28 }
  0x29   : > { %p718_p11 = pneg %p717_p6  ;;  %p724_p10 = por %p723_p4, %p722_p9 }
  0x2b   : > { %p725_p12 = pnand %p724_p10, %p718_p11 }
  0x2d   : > { %728 = shalt.err (!%p725_p12)
}
  0x2e   : > { %632 = dma.hbm_to_vmem [thread:$0]  (!%p945_p0), %s939_s6, 128, %s941_s8, %s185_s10  }
  0x2f   : > { %p1127_p1 = scmp.lt.s32.totalorder %s843_s17, 3  ;;  %p1128_p2 = scmp.ge.s32.totalorder %s843_s17, 1 }
  0x31   : > { %p225_p5 = pnand %p1128_p2, %p1127_p1 }
  0x32   : > { %s981_s5 = sand.u32 (!%p225_p5), 1, %s827_s13  }
  0x33   : > { %228 = sbr.rel (%p225_p5) target bundleno = 312 (0x138), region = 28  ;;  %s615_s7 = sshll.u32 (!%p225_p5), %s981_s5, 3 }
  0x34   : > { %s231_s11 = scalar_lea.sflag (!%p225_p5), [#allocation3], %s981_s5  ;;  %s234_s18 = scalar_lea.vmem (!%p225_p5), [#allocation2], %s615_s7 }
  0x3a   : > { %810 = dma.done.wait (%p917_p8), %s231_s11, 128  }
  0x3b   : > { %812 = vsyncadd (%p917_p8), %s231_s11, 4294967168  ;;  %s990_s6 = scalar_lea.vmem [#allocation5], %s981_s5  ;;  %v846_v0 = vmov 0.0   ;;  %p279_p9 = scmp.lt.s32.totalorder %s835_s15, 1  ;;  %vm320_vm0 = vcmask 1043456   ;;  %v298_v1 = vld [vmem:[%s234_s18] sm:$0xff]  ;;  %v340_v10 = vlaneseq }
  0x3c   : > { %296 = vst [vmem:[%s990_s6] sm:$0x1] %v846_v0  ;;  %v318_v2 = vcombine.high %v298_v1, %v298_v1  ;;  %v321_v3 = vsel %vm320_vm0, %v298_v1, -inf  ;;  %v847_v60 = vmov 1   ;;  %vm420_vm6 = vcmask 1040384   ;;  %s1019_s21 = scalar_lea.vmem [#allocation6], %s981_s5  ;;  %s618_s22 = sshll.u32 %s835_s15, 4 }
  0x3d   : > { %s280_s8 = scalar_select %p279_p9, %s835_s15, 1  ;;  %v322_v4 = vrot.slane %v321_v3, 4  ;;  %v341_v15 = vshrl.u32 %v340_v10, 7  ;;  %v314_v61 = vcombine.low %v847_v60, %v847_v60  ;;  %297 = vst [vmem:[%s1019_s21] sm:$0x1] %v846_v0 }
  0x3e   : > { %v328_v5 = vsel %vm320_vm0, %v318_v2, -inf  ;;  %s468_s23 = sshll.u32 %s990_s6, 4  ;;  %s1031_s30 = scalar_lea.hbm %s1119_s2, %s618_s22  ;;  %s1033_s23 = int_to_ptr.vmem [resolvable:$true] %s468_s23 }
  0x3f   : > { %v323_v6 = vmax.f32 %v321_v3, %v322_v4  ;;  %v329_v7 = vrot.slane %v328_v5, 4  ;;  %s616_s24 = sshll.u32 %s280_s8, 1  ;;  %v1001_v21 = vsub.s32 0, %v341_v15  ;;  %v1003_v23 = vsub.s32 4, %v341_v15  ;;  %s482_s4 = sshll.u32 %s1019_s21, 4  ;;  %s1069_s4 = int_to_ptr.vmem [resolvable:$true] %s482_s4 }
  0x40   : > { %s285_s19 = scalar_lea.vmem %s1118_s1, %s616_s24  ;;  %vm315_vm4 = vcmp.ne.s32.totalorder %v314_v61, 0  ;;  %s451_s7 = scalar_lea.sflag [#allocation4], %s981_s5 }
  0x41   : > { %v324_v8 = vrot.slane %v323_v6, 2  ;;  %v330_v9 = vmax.f32 %v328_v5, %v329_v7  ;;  %v299_v16 = vld [vmem:[%s285_s19] sm:$0x3]  ;;  %s729_s11 = scalar_lea.vmem %s1033_s23, 16  ;;  %p1129_p11 = scmp.ne.s32.totalorder %s1124_s25, 0 }
  0x42   : > { %v300_v19 = vunpack.c.0.s8 %v299_v16  ;;  %p730_p8 = scmp.ne.s32.totalorder %s1033_s23, %s729_s11  ;;  %s848_s18 = smov [#allocation5]  }
  0x43   : > { %v325_v11 = vmax.f32 %v323_v6, %v324_v8  ;;  %v331_v12 = vrot.slane %v330_v9, 2  ;;  %s733_s8 = sshll.u32 %s848_s18, 4  ;;  %s734_s8 = int_to_ptr.vmem [resolvable:$false] %s733_s8 }
  0x44   : > { %v345_v25 = vrot.slane %v300_v19, %v1001_v21  ;;  %v349_v26 = vrot.slane %v300_v19, %v1003_v23  ;;  %vm305_vm3 = vcmp.lt.s32.totalorder %v300_v19, 4  ;;  %p731_p0 = pnand %p730_p8, %p1129_p11  ;;  %s735_s24 = scalar_lea.vmem %s734_s8, 32 }
  0x45   : > { %v326_v13 = vrot.slane %v325_v11, 1  ;;  %v332_v14 = vmax.f32 %v330_v9, %v331_v12  ;;  %vm316_vm5 = vmand %vm305_vm3, %vm315_vm4  ;;  %p736_p13 = scmp.lt.s32.totalorder %s1033_s23, %s734_s8  ;;  %p737_p3 = scmp.lt.s32.totalorder %s735_s24, %s729_s11 }
  0x46   : > { %v353_v28 = vrot.slane %v345_v25, %v1001_v21  ;;  %v357_v29 = vrot.slane %v349_v26, %v1001_v21  ;;  %v617_v8 = vsel %vm316_vm5, 1.0, %v846_v0  ;;  %p732_p7 = pneg %p731_p0 }
  0x47   : > { %v327_v17 = vmax.f32 %v325_v11, %v326_v13  ;;  %v333_v18 = vrot.slane %v332_v14, 1  ;;  %v432_v10 = vrot.slane %v617_v8, %v1001_v21  ;;  %v436_v11 = vrot.slane %v617_v8, %v1003_v23  ;;  %p738_p6 = por %p737_p3, %p736_p13 }
  0x48   : > { %vm358_vm1 = vcmp.eq.s32.totalorder %v341_v15, %v353_v28  ;;  %vm359_vm2 = vcmp.eq.s32.totalorder %v341_v15, %v357_v29 }
  0x49   : > { %v334_v20 = vmax.f32 %v332_v14, %v333_v18  ;;  %v440_v18 = vsel %vm420_vm6, %v436_v11, 0.0  ;;  %p739_p4 = pnand %p738_p6, %p732_p7 }
  0x4b   : > { %v337_v22 = vcombine.low %v327_v17, %v334_v20  ;;  %v439_v17 = vsel %vm420_vm6, %v432_v10, 0.0 }
  0x4c   : > { %v441_v20 = vadd.f32 %v440_v18, %v439_v17 }
  0x4d   : > { %v339_v24 = vsub.f32 %v298_v1, %v337_v22 }
  0x4f   : > { %v379_v27 = vmul.f32 1.442695, %v339_v24  ;;  %v361_v30 = vcombine.high %v339_v24, %v339_v24  ;;  %v363_v31 = vsel %vm358_vm1, %v339_v24, 0.0  ;;  %v447_v24 = vld [vmem:[%s1019_s21] sm:$0x1] }
  0x50   : > { %v365_v34 = vsel %vm320_vm0, %v363_v31, 0.0 }
  0x51   : > { %693 = vpow2.f32 %v379_v27  ;;  %v364_v32 = vsel %vm359_vm2, %v361_v30, 0.0  ;;  %v366_v39 = vrot.slane %v365_v34, 4 }
  0x52   : > { %v372_v37 = vsel %vm320_vm0, %v364_v32, 0.0 }
  0x53   : > { %v373_v43 = vrot.slane %v372_v37, 4  ;;  %v367_v46 = vadd.f32 %v366_v39, %v365_v34 }
  0x55   : > { %v374_v49 = vadd.f32 %v373_v43, %v372_v37  ;;  %v368_v52 = vrot.slane %v367_v46, 2 }
  0x57   : > { %v375_v55 = vrot.slane %v374_v49, 2  ;;  %v369_v57 = vadd.f32 %v368_v52, %v367_v46 }
  0x59   : > { %v376_v58 = vadd.f32 %v375_v55, %v374_v49  ;;  %v370_v59 = vrot.slane %v369_v57, 1 }
  0x5b   : > { %v694_v33 = vpop.eup %693  ;;  %v377_v62 = vrot.slane %v376_v58, 1  ;;  %v371_v63 = vadd.f32 %v370_v59, %v369_v57 }
  0x5c   : > { %v382_v35 = vcombine.high %v694_v33, %v694_v33  ;;  %v384_v36 = vsel %vm320_vm0, %v694_v33, 0.0 }
  0x5d   : > { %v385_v38 = vrot.slane %v384_v36, 4  ;;  %v378_v2 = vadd.f32 %v377_v62, %v376_v58 }
  0x5e   : > { %v391_v40 = vsel %vm320_vm0, %v382_v35, 0.0 }
  0x5f   : > { %v386_v41 = vadd.f32 %v385_v38, %v384_v36  ;;  %v392_v42 = vrot.slane %v391_v40, 4 }
  0x61   : > { %v387_v44 = vrot.slane %v386_v41, 2  ;;  %v393_v45 = vadd.f32 %v392_v42, %v391_v40 }
  0x63   : > { %v388_v47 = vadd.f32 %v387_v44, %v386_v41  ;;  %v394_v48 = vrot.slane %v393_v45, 2 }
  0x65   : > { %v389_v50 = vrot.slane %v388_v47, 1  ;;  %v395_v51 = vadd.f32 %v394_v48, %v393_v45 }
  0x67   : > { %v390_v53 = vadd.f32 %v389_v50, %v388_v47  ;;  %v396_v54 = vrot.slane %v395_v51, 1 }
  0x69   : > { %v397_v56 = vadd.f32 %v396_v54, %v395_v51  ;;  %695 = vlog2.f32 %v390_v53 }
  0x6b   : > { %697 = vlog2.f32 %v397_v56 }
  0x73   : > { %v696_v1 = vpop.eup %695 }
  0x74   : > { %v399_v3 = vmul.f32 0.6931472, %v696_v1 }
  0x75   : > { %v698_v4 = vpop.eup %697 }
  0x76   : > { %v401_v5 = vmul.f32 0.6931472, %v698_v4  ;;  %v402_v6 = vsub.f32 %v399_v3, %v371_v63 }
  0x78   : > { %v403_v7 = vsub.f32 %v401_v5, %v378_v2 }
  0x7a   : > { %v406_v9 = vcombine.low %v402_v6, %v403_v7 }
  0x7c   : > { %v408_v12 = vsel %vm316_vm5, %v406_v9, 0.0 }
  0x7d   : > { %v413_v13 = vrot.slane %v408_v12, %v1001_v21  ;;  %v417_v14 = vrot.slane %v408_v12, %v1003_v23  ;;  %v444_v21 = vld [vmem:[%s990_s6] sm:$0x1] }
  0x7f   : > { %v421_v15 = vsel %vm420_vm6, %v413_v13, 0.0  ;;  %v422_v16 = vsel %vm420_vm6, %v417_v14, 0.0 }
  0x80   : > { %v423_v19 = vadd.f32 %v422_v16, %v421_v15 }
  0x82   : > { %424 = vadd.xlane.f32.xlu0 %v423_v19 }
  0x86   : > { %442 = vadd.xlane.f32.xlu0 %v441_v20 }
 0x10f   : > { %v425_v22 = vpop.xlane.xlu0 %424 }
 0x110   : > { %v445_v23 = vadd.f32 %v444_v21, %v425_v22 }
 0x112   : > { %446 = vst [vmem:[%s990_s6] sm:$0x1] %v445_v23 }
 0x113   : > { %v443_v0 = vpop.xlane.xlu0 %442 }
 0x114   : > { %742 = shalt.err (!%p739_p4)
}
 0x115   : > { %s743_s6 = scalar_lea.hbm %s1031_s30, 16  ;;  %s747_s19 = scalar_lea.hbm %s1119_s2, 32 }
 0x116   : > { %p744_p10 = scmp.ne.s32.totalorder %s1031_s30, %s743_s6  ;;  %p748_p2 = scmp.lt.u32.totalorder %s1031_s30, %s1119_s2 }
 0x117   : > { %p749_p5 = scmp.lt.u32.totalorder %s747_s19, %s743_s6  ;;  %p751_p8 = scmp.lt.u32.totalorder %s743_s6, %s1031_s30 }
 0x118   : > { %p745_p12 = pnand %p744_p10, %p1129_p11 }
 0x119   : > { %p750_p9 = por %p749_p5, %p748_p2 }
 0x11a   : > { %p746_p1 = pneg %p745_p12 }
 0x11b   : > { %p752_p0 = por %p751_p8, %p750_p9 }
 0x11d   : > { %p753_p7 = pnand %p752_p0, %p746_p1 }
 0x11f   : > { %756 = shalt.err (!%p753_p7)
}
 0x120   : > { %625 = dma.vmem_to_hbm [thread:$0]  (%p1129_p11), %s1033_s23, 16, %s1031_s30, %s451_s7   ;;  %v448_v25 = vadd.f32 %v447_v24, %v443_v0 }
 0x121   : > { %s1065_s8 = scalar_lea.hbm %s1120_s3, %s618_s22  ;;  %s455_s24 = scalar_lea.sflag [#allocation7], %s981_s5 }
 0x122   : > { %449 = vst [vmem:[%s1019_s21] sm:$0x1] %v448_v25  ;;  %s757_s6 = scalar_lea.vmem %s1069_s4, 16  ;;  %s849_s23 = smov [#allocation6]  }
 0x123   : > { %p758_p13 = scmp.ne.s32.totalorder %s1069_s4, %s757_s6  ;;  %s761_s15 = sshll.u32 %s849_s23, 4  ;;  %s762_s15 = int_to_ptr.vmem [resolvable:$false] %s761_s15 }
 0x124   : > { %s763_s30 = scalar_lea.vmem %s762_s15, 32  ;;  %p764_p4 = scmp.lt.s32.totalorder %s1069_s4, %s762_s15 }
 0x125   : > { %p759_p3 = pnand %p758_p13, %p1129_p11  ;;  %p765_p10 = scmp.lt.s32.totalorder %s763_s30, %s757_s6 }
 0x127   : > { %p760_p6 = pneg %p759_p3  ;;  %p766_p12 = por %p765_p10, %p764_p4 }
 0x129   : > { %p767_p1 = pnand %p766_p12, %p760_p6 }
 0x12b   : > { %770 = shalt.err (!%p767_p1)
}
 0x12c   : > { %s771_s5 = scalar_lea.hbm %s1065_s8, 16  ;;  %s775_s7 = scalar_lea.hbm %s1120_s3, 32 }
 0x12d   : > { %p772_p2 = scmp.ne.s32.totalorder %s1065_s8, %s771_s5  ;;  %p776_p8 = scmp.lt.u32.totalorder %s1065_s8, %s1120_s3 }
 0x12e   : > { %p777_p0 = scmp.lt.u32.totalorder %s775_s7, %s771_s5  ;;  %p779_p13 = scmp.lt.u32.totalorder %s771_s5, %s1065_s8 }
 0x12f   : > { %p773_p5 = pnand %p772_p2, %p1129_p11 }
 0x130   : > { %p778_p7 = por %p777_p0, %p776_p8 }
 0x131   : > { %p774_p9 = pneg %p773_p5 }
 0x132   : > { %p780_p3 = por %p779_p13, %p778_p7 }
 0x134   : > { %p781_p6 = pnand %p780_p3, %p774_p9 }
 0x136   : > { %784 = shalt.err (!%p781_p6)
}
 0x137   : > { %626 = dma.vmem_to_hbm [thread:$0]  (%p1129_p11), %s1069_s4, 16, %s1065_s8, %s455_s24  }
 0x138 PF: > { %s494_s19 = sand.u32 1, %s823_s12   ;;  %p1130_p4 = scmp.ne.s32.totalorder %s1125_s27, 0 }
 0x139   : > { %p1131_p10 = scmp.ge.s32.totalorder %s843_s17, 2  ;;  %s495_s28 = scalar_lea.sflag [#allocation4], %s494_s19 }
 0x13b   : > { %p634_p12 = pnand %p1131_p10, %p1130_p4 }
 0x13d   : > { %814 = dma.done.wait (!%p634_p12), %s495_s28, 16  }
 0x13e   : > { %816 = vsyncadd (!%p634_p12), %s495_s28, 4294967280  ;;  %s503_s29 = scalar_lea.sflag [#allocation7], %s494_s19 }
 0x13f   : > { %818 = dma.done.wait (!%p634_p12), %s503_s29, 16  }
 0x140   : > { %820 = vsyncadd (!%p634_p12), %s503_s29, 4294967280  ;;  %s23_s17 = sadd.s32 1, %s843_s17   ;;  %s1132_s12 = smov %s827_s13 }
 0x141   : > { %p20_p1 = scmp.ge.s32.totalorder %s23_s17, 4   ;;  %s1133_s13 = smov %s831_s14 }
 0x142   : > { %s1134_s14 = smov %s926_s26  ;;  %s1135_s15 = smov %s839_s16 }
 0x143   : > { %s1136_s16 = smov %s1138_s20  ;;  %22 = sbr.rel (!%p20_p1) target bundleno = 8 (0x8), region = 97 }
 0x14a   :  { %507 = vsyncpa [#allocation3], 1 }
 0x14b   :  { %509 = vsyncpa [#allocation3 + $0x1], 1 }
 0x14c   :  { %510 = vsyncpa [#allocation4], 1 }
 0x14d   :  { %512 = vsyncpa [#allocation4 + $0x1], 1 }
 0x14e   :  { %513 = vsyncpa [#allocation7], 1 }
 0x14f   :  { %515 = vsyncpa [#allocation7 + $0x1], 1 }

</bundles_post_ra>
